<compile_context>
chip_gen: v5e
topology: v5e:2x2
jax: 0.10.0
libtpu: 0.0.40
codegen_flags: <defaults>
</compile_context>

<pallas_src>
import jax
import jax.numpy as jnp
from jax.experimental import pallas as pl
from jax.experimental.pallas import tpu as pltpu


def _se_kernel(x_ref, w1_ref, w2_ref, o_ref):
    # x_ref: (TB, HW, C) channels-last
    # w1_ref: (C, Cr)  (torch W1.T, pre-scaled by 1/HW in the wrapper)
    # w2_ref: (Cr, C)  (torch W2.T)
    # o_ref: (TB, HW, C)
    x = x_ref[...]                                              # one load, x.dtype

    # squeeze: sum over spatial (sublane reduce); 1/HW is folded into w1.
    pooled = jnp.sum(x.astype(jnp.float32), axis=1)             # (TB, C), f32 acc

    # excitation: FC1 -> ReLU -> FC2 -> sigmoid, all (TB, *) batched matmuls.
    h = jnp.dot(pooled, w1_ref[...], preferred_element_type=jnp.float32)   # (TB, Cr)
    h = jnp.maximum(h, 0.0)
    g = jnp.dot(h, w2_ref[...], preferred_element_type=jnp.float32)        # (TB, C)
    g = jax.nn.sigmoid(g)

    # scale: per-channel gate broadcast over spatial (sublanes).  Apply the gate
    # in x.dtype so the dominant elementwise pass is not double-upcast to f32.
    o_ref[...] = (x * g[:, None, :].astype(x.dtype)).astype(o_ref.dtype)


def _pick_tb(B, HW, C, itemsize, vmem_budget_bytes=24 * 1024 * 1024):
    """Images per grid step: biggest block within budget, >=2 grid steps if B>=2."""
    per_img = max(1, HW * C * itemsize)
    # Double-buffered input + output blocks => ~4 block copies resident.
    max_tb = max(1, int(vmem_budget_bytes // (4 * per_img)))
    tb_cap = max(1, min(max_tb, B if B < 2 else B // 2))
    tb = tb_cap
    while B % tb != 0:          # exact blocking, no partial batch tiles
        tb -= 1
    return max(tb, 1)


def _make_spec(shape, index_map, *, buffers=2):
    # Deeper pipelining only helps when blocks are tiny; guard so older jax
    # versions without pipeline_mode / pl.Buffered still construct a plain spec.
    if buffers > 2:
        try:
            return pl.BlockSpec(shape, index_map, pipeline_mode=pl.Buffered(buffers))
        except (AttributeError, TypeError):
            pass
    return pl.BlockSpec(shape, index_map)


def se_layer(x_nchw, w1_t, w2_t, *, tb=None, vmem_limit_bytes=48 * 1024 * 1024):
    """x_nchw: (B, C, H, W); w1_t: (C, C//r); w2_t: (C//r, C).

    w1_t / w2_t are the transposed torch Linear weights so the kernel computes
    y @ w1_t and h @ w2_t (== torch's y @ W1.T, h @ W2.T).
    """
    B, C, H, W = x_nchw.shape
    HW = H * W
    Cr = w1_t.shape[1]

    # channels-last: (B, HW, C) with C on lanes (layout plumbing in the wrapper).
    x = jnp.transpose(x_nchw, (0, 2, 3, 1)).reshape(B, HW, C)

    # fold the 1/HW mean factor into w1; keep excitation weights in f32.
    w1_s = w1_t.astype(jnp.float32) * (1.0 / HW)
    w2_f = w2_t.astype(jnp.float32)

    if tb is None:
        tb = _pick_tb(B, HW, C, x.dtype.itemsize)
    num_steps = B // tb

    block_bytes = tb * HW * C * x.dtype.itemsize
    buffers = 3 if (block_bytes < (1 << 20) and num_steps >= 3) else 2

    out = pl.pallas_call(
        _se_kernel,
        out_shape=jax.ShapeDtypeStruct((B, HW, C), x.dtype),
        grid_spec=pltpu.PrefetchScalarGridSpec(
            num_scalar_prefetch=0,
            grid=(num_steps,),
            in_specs=[
                _make_spec((tb, HW, C), lambda b: (b, 0, 0), buffers=buffers),
                pl.BlockSpec((C, Cr), lambda b: (0, 0)),
                pl.BlockSpec((Cr, C), lambda b: (0, 0)),
            ],
            out_specs=_make_spec((tb, HW, C), lambda b: (b, 0, 0), buffers=buffers),
        ),
        compiler_params=pltpu.CompilerParams(
            dimension_semantics=("parallel",),
            vmem_limit_bytes=vmem_limit_bytes,
        ),
    )(x, w1_s, w2_f)

    return jnp.transpose(out.reshape(B, H, W, C), (0, 3, 1, 2))


def se_layer_ref(x, w1_t, w2_t):
    y = jnp.mean(x.astype(jnp.float32), axis=(2, 3))            # (B, C)
    h = jnp.maximum(y @ w1_t.astype(jnp.float32), 0.0)
    s = jax.nn.sigmoid(h @ w2_t.astype(jnp.float32))
    return (x.astype(jnp.float32) * s[:, :, None, None]).astype(x.dtype)


if __name__ == "__main__":
    B, C, H, W = 2, 64, 16, 16
    reduction = 16
    Cr = C // reduction

    key = jax.random.PRNGKey(0)
    kx, k1, k2 = jax.random.split(key, 3)
    x = jax.random.normal(kx, (B, C, H, W), dtype=jnp.float32)
    # deterministic synthetic weights (torch Linear weights, pre-transposed)
    w1_t = jax.random.normal(k1, (C, Cr), dtype=jnp.float32) * (1.0 / C) ** 0.5
    w2_t = jax.random.normal(k2, (Cr, C), dtype=jnp.float32) * (1.0 / Cr) ** 0.5

    out = se_layer(x, w1_t, w2_t)
    out = jax.block_until_ready(out)

    ref = se_layer_ref(x, w1_t, w2_t)
    assert out.shape == (B, C, H, W)
    assert jnp.allclose(out, ref, atol=1e-5, rtol=1e-5)

    print("KERNEL_OK")
</pallas_src>

<mosaic_0001>
module attributes {stable_mosaic.version = 11 : i64} {
  func.func @_se_kernel(%arg0: i32, %arg1: memref<1x256x64xf32, #tpu.memory_space<vmem>>, %arg2: memref<64x4xf32, #tpu.memory_space<vmem>>, %arg3: memref<4x64xf32, #tpu.memory_space<vmem>>, %arg4: memref<1x256x64xf32, #tpu.memory_space<vmem>>) attributes {dimension_semantics = [#tpu.dimension_semantics<parallel>], iteration_bounds = array<i64: 2>, scalar_prefetch = 0 : i64, scratch_operands = 0 : i64, tpu.core_type = #tpu.core_type<tc>, window_params = [{transform_indices = @transform_0, window_bounds = array<i64: 1, 256, 64>}, {pipeline_mode = #tpu.pipeline_mode<synchronous>, transform_indices = @transform_1, window_bounds = array<i64: 64, 4>}, {pipeline_mode = #tpu.pipeline_mode<synchronous>, transform_indices = @transform_2, window_bounds = array<i64: 4, 64>}, {transform_indices = @transform_3, window_bounds = array<i64: 1, 256, 64>}]} {
    %c0 = arith.constant 0 : index
    %c0_0 = arith.constant 0 : index
    %c0_1 = arith.constant 0 : index
    %0 = vector.load %arg1[%c0, %c0_0, %c0_1] : memref<1x256x64xf32, #tpu.memory_space<vmem>>, vector<1x256x64xf32>
    %cst = arith.constant dense<0.000000e+00> : vector<1x64xf32>
    %1 = vector.multi_reduction <add>, %0, %cst [1] : vector<1x256x64xf32> to vector<1x64xf32>
    %c0_2 = arith.constant 0 : index
    %c0_3 = arith.constant 0 : index
    %2 = vector.load %arg2[%c0_2, %c0_3] : memref<64x4xf32, #tpu.memory_space<vmem>>, vector<64x4xf32>
    %cst_4 = arith.constant dense<0.000000e+00> : vector<1x4xf32>
    %3 = tpu.matmul %1, %2, %cst_4 {dimension_numbers = #tpu.dot_dimension_numbers<[1], [0], [0], [1], [0, 0, 1, 1], [], []>} : vector<1x64xf32>, vector<64x4xf32>, vector<1x4xf32> -> vector<1x4xf32>
    %cst_5 = arith.constant 0.000000e+00 : f32
    %4 = vector.broadcast %cst_5 : f32 to vector<1x4xf32>
    %5 = arith.maximumf %3, %4 : vector<1x4xf32>
    %c0_6 = arith.constant 0 : index
    %c0_7 = arith.constant 0 : index
    %6 = vector.load %arg3[%c0_6, %c0_7] : memref<4x64xf32, #tpu.memory_space<vmem>>, vector<4x64xf32>
    %cst_8 = arith.constant dense<0.000000e+00> : vector<1x64xf32>
    %7 = tpu.matmul %5, %6, %cst_8 {dimension_numbers = #tpu.dot_dimension_numbers<[1], [0], [0], [1], [0, 0, 1, 1], [], []>} : vector<1x4xf32>, vector<4x64xf32>, vector<1x64xf32> -> vector<1x64xf32>
    %8 = arith.negf %7 : vector<1x64xf32>
    %9 = math.exp %8 : vector<1x64xf32>
    %cst_9 = arith.constant 1.000000e+00 : f32
    %10 = vector.broadcast %cst_9 : f32 to vector<1x64xf32>
    %11 = arith.addf %10, %9 : vector<1x64xf32>
    %12 = arith.divf %10, %11 : vector<1x64xf32>
    %13 = vector.shape_cast %12 : vector<1x64xf32> to vector<1x1x64xf32>
    %14 = vector.broadcast %13 : vector<1x1x64xf32> to vector<1x256x64xf32>
    %15 = arith.mulf %0, %14 : vector<1x256x64xf32>
    %c0_10 = arith.constant 0 : index
    %c0_11 = arith.constant 0 : index
    %c0_12 = arith.constant 0 : index
    %16 = vector.load %arg4[%c0_10, %c0_11, %c0_12] : memref<1x256x64xf32, #tpu.memory_space<vmem>>, vector<1x256x64xf32>
    tpu.vector_store %arg4[%c0_10, %c0_11, %c0_12], %15 {strides = array<i32>} : memref<1x256x64xf32, #tpu.memory_space<vmem>>, vector<1x256x64xf32>,
    return
  }
  func.func @transform_0(%arg0: i32) -> (i32, i32, i32) {
    %c0_i32 = arith.constant 0 : i32
    %c0_i32_0 = arith.constant 0 : i32
    %c0_i32_1 = arith.constant 0 : i32
    return %arg0, %c0_i32, %c0_i32_0 : i32, i32, i32
  }
  func.func @transform_1(%arg0: i32) -> (i32, i32) {
    %c0_i32 = arith.constant 0 : i32
    %c0_i32_0 = arith.constant 0 : i32
    %c0_i32_1 = arith.constant 0 : i32
    return %c0_i32, %c0_i32_0 : i32, i32
  }
  func.func @transform_2(%arg0: i32) -> (i32, i32) {
    %c0_i32 = arith.constant 0 : i32
    %c0_i32_0 = arith.constant 0 : i32
    %c0_i32_1 = arith.constant 0 : i32
    return %c0_i32, %c0_i32_0 : i32, i32
  }
  func.func @transform_3(%arg0: i32) -> (i32, i32, i32) {
    %c0_i32 = arith.constant 0 : i32
    %c0_i32_0 = arith.constant 0 : i32
    %c0_i32_1 = arith.constant 0 : i32
    return %arg0, %c0_i32, %c0_i32_0 : i32, i32, i32
  }
}

</mosaic_0001>

<bundles_post_ra>
// kernel: tpu_custom_call.1
= control target key start
LH: loop header
LB: loop body
LE: loop exit
PB: predicated region body
PF: predicated region fallthrough
CT: control target
= control target key end

     0   :  { %s530_s12 = smov 0   ;;  %s842_s0 = inlined_call_operand.vmem [shape: f32[2,256,64], index: 0, kind: input, shape index: {}]   ;;  %s843_s1 = inlined_call_operand.vmem [shape: f32[64,4], index: 1, kind: input, shape index: {}]   ;;  %s844_s2 = inlined_call_operand.vmem [shape: f32[4,64], index: 2, kind: input, shape index: {}]   ;;  %s845_s3 = inlined_call_operand.vmem [shape: f32[2,256,64], index: 3, kind: output, shape index: {}]  }
   0x1 LB: > { %s473_s13 = sadd.s32 4294967295, %s508_s12   ;;  %p477_p0 = scmp.ge.s32.totalorder %s508_s12, 1  ;;  %s508_s12 = sphi %s530_s12, %s13_s12  }
   0x2   : > { %p137_p1 = scmp.lt.s32.totalorder %s508_s12, 3 }
   0x4   : > { %p138_p2 = pnand %p477_p0, %p137_p1 }
   0x5   : > { %p161_p3 = scmp.lt.s32.totalorder (!%p138_p2), %s473_s13, 1 }
   0x6   : > { %141 = sbr.rel (%p138_p2) target bundleno = 408 (0x198), region = 32 }
   0xb   : > { %v280_v0 = vld [vmem:[%s843_s1 + $0x38] sm:$0xff]  ;;  %v279_v1 = vld [vmem:[%s843_s1 + $0x30] sm:$0xff]  ;;  %v278_v2 = vld [vmem:[%s843_s1 + $0x28] sm:$0xff]  ;;  %s847_s13 = smov (!%p161_p3, %s473_s13), 1  ;;  %vm203_vm0 = vcmask 523264   ;;  %vm310_vm1 = vcmask 1043456  }
   0xc   : > { %292 = vmatpush.msra.mxu0 %v280_v0  ;;  %v277_v3 = vld [vmem:[%s843_s1 + $0x20] sm:$0xff]  ;;  %s488_s22 = sshll.u32 %s847_s13, 8  ;;  %v276_v4 = vld [vmem:[%s843_s1 + $0x18] sm:$0xff]  ;;  %v275_v12 = vld [vmem:[%s843_s1 + $0x10] sm:$0xff]  ;;  %vm306_vm2 = vcmask 31744  }
   0xd   : > { %s561_s27 = scalar_lea.vmem %s842_s0, %s488_s22  ;;  %v274_v16 = vld [vmem:[%s843_s1 + $0x8] sm:$0xff]  ;;  %v273_v20 = vld [vmem:[%s843_s1] sm:$0xff]  ;;  %s741_s11 = scalar_lea.vmem %s845_s3, %s488_s22 }
   0xe   : > { %293 = vmatpush.msra.mxu0 %v279_v1  ;;  %v564_v5 = vld [vmem:[%s561_s27] sm:$0xff]  ;;  %v567_v6 = vld [vmem:[%s561_s27 + $0x8] sm:$0xff]  ;;  %v570_v7 = vld [vmem:[%s561_s27 + $0x10] sm:$0xff] }
   0xf   : > { %v573_v8 = vld [vmem:[%s561_s27 + $0x18] sm:$0xff]  ;;  %v204_v9 = vsel %vm203_vm0, %v564_v5, 0.0  ;;  %v205_v10 = vsel %vm203_vm0, %v567_v6, 0.0  ;;  %v207_v11 = vsel %vm203_vm0, %v570_v7, 0.0  ;;  %v585_v13 = vld [vmem:[%s561_s27 + $0x20] sm:$0xff]  ;;  %v593_v17 = vld [vmem:[%s561_s27 + $0x28] sm:$0xff] }
  0x10   : > { %294 = vmatpush.msra.mxu0 %v278_v2  ;;  %v206_v14 = vadd.f32 %v205_v10, %v204_v9  ;;  %v209_v15 = vsel %vm203_vm0, %v573_v8, 0.0  ;;  %v211_v19 = vsel %vm203_vm0, %v585_v13, 0.0  ;;  %v601_v21 = vld [vmem:[%s561_s27 + $0x30] sm:$0xff]  ;;  %v213_v23 = vsel %vm203_vm0, %v593_v17, 0.0  ;;  %v606_v24 = vld [vmem:[%s561_s27 + $0x38] sm:$0xff]  ;;  %v611_v27 = vld [vmem:[%s561_s27 + $0x40] sm:$0xff] }
  0x11   : > { %v215_v26 = vsel %vm203_vm0, %v601_v21, 0.0  ;;  %v217_v29 = vsel %vm203_vm0, %v606_v24, 0.0  ;;  %v616_v30 = vld [vmem:[%s561_s27 + $0x48] sm:$0xff]  ;;  %v219_v32 = vsel %vm203_vm0, %v611_v27, 0.0  ;;  %v621_v33 = vld [vmem:[%s561_s27 + $0x50] sm:$0xff]  ;;  %v626_v36 = vld [vmem:[%s561_s27 + $0x58] sm:$0xff] }
  0x12   : > { %295 = vmatpush.msra.mxu0 %v277_v3  ;;  %v208_v18 = vadd.f32 %v207_v11, %v206_v14  ;;  %v221_v35 = vsel %vm203_vm0, %v616_v30, 0.0  ;;  %v223_v38 = vsel %vm203_vm0, %v621_v33, 0.0  ;;  %v631_v39 = vld [vmem:[%s561_s27 + $0x60] sm:$0xff]  ;;  %v225_v41 = vsel %vm203_vm0, %v626_v36, 0.0  ;;  %v636_v42 = vld [vmem:[%s561_s27 + $0x68] sm:$0xff]  ;;  %v641_v45 = vld [vmem:[%s561_s27 + $0x70] sm:$0xff] }
  0x13   : > { %v227_v44 = vsel %vm203_vm0, %v631_v39, 0.0  ;;  %v229_v47 = vsel %vm203_vm0, %v636_v42, 0.0  ;;  %v646_v48 = vld [vmem:[%s561_s27 + $0x78] sm:$0xff]  ;;  %v231_v50 = vsel %vm203_vm0, %v641_v45, 0.0  ;;  %v651_v51 = vld [vmem:[%s561_s27 + $0x80] sm:$0xff]  ;;  %v656_v54 = vld [vmem:[%s561_s27 + $0x88] sm:$0xff] }
  0x14   : > { %296 = vmatpush.msra.mxu0 %v276_v4  ;;  %v210_v22 = vadd.f32 %v209_v15, %v208_v18  ;;  %v233_v53 = vsel %vm203_vm0, %v646_v48, 0.0  ;;  %v235_v56 = vsel %vm203_vm0, %v651_v51, 0.0  ;;  %v661_v57 = vld [vmem:[%s561_s27 + $0x90] sm:$0xff]  ;;  %v237_v59 = vsel %vm203_vm0, %v656_v54, 0.0  ;;  %v666_v60 = vld [vmem:[%s561_s27 + $0x98] sm:$0xff]  ;;  %v671_v63 = vld [vmem:[%s561_s27 + $0xa0] sm:$0xff] }
  0x15   : > { %v239_v62 = vsel %vm203_vm0, %v661_v57, 0.0  ;;  %v241_v1 = vsel %vm203_vm0, %v666_v60, 0.0  ;;  %v676_v2 = vld [vmem:[%s561_s27 + $0xa8] sm:$0xff]  ;;  %v243_v4 = vsel %vm203_vm0, %v671_v63, 0.0  ;;  %v681_v9 = vld [vmem:[%s561_s27 + $0xb0] sm:$0xff] }
  0x16   : > { %297 = vmatpush.msra.mxu0 %v275_v12  ;;  %v212_v25 = vadd.f32 %v211_v19, %v210_v22  ;;  %v245_v11 = vsel %vm203_vm0, %v676_v2, 0.0  ;;  %v686_v12 = vld [vmem:[%s561_s27 + $0xb8] sm:$0xff]  ;;  %v247_v15 = vsel %vm203_vm0, %v681_v9, 0.0 }
  0x17   : > { %v249_v19 = vsel %vm203_vm0, %v686_v12, 0.0 }
  0x18   : > { %298 = vmatpush.msra.mxu0 %v274_v16  ;;  %v214_v28 = vadd.f32 %v213_v23, %v212_v25  ;;  %v691_v16 = vld [vmem:[%s561_s27 + $0xc0] sm:$0xff]  ;;  %v701_v25 = vld [vmem:[%s561_s27 + $0xd0] sm:$0xff] }
  0x19   : > { %v251_v23 = vsel %vm203_vm0, %v691_v16, 0.0 }
  0x1a   : > { %299 = vmatpush.msra.mxu0 %v273_v20  ;;  %v216_v31 = vadd.f32 %v215_v26, %v214_v28  ;;  %v696_v20 = vld [vmem:[%s561_s27 + $0xc8] sm:$0xff] }
  0x1b   : > { %v253_v28 = vsel %vm203_vm0, %v696_v20, 0.0 }
  0x1c   : > { %v218_v34 = vadd.f32 %v217_v29, %v216_v31  ;;  %v706_v29 = vld [vmem:[%s561_s27 + $0xd8] sm:$0xff] }
  0x1e   : > { %v220_v37 = vadd.f32 %v219_v32, %v218_v34  ;;  %v255_v32 = vsel %vm203_vm0, %v701_v25, 0.0  ;;  %v711_v34 = vld [vmem:[%s561_s27 + $0xe0] sm:$0xff] }
  0x20   : > { %v222_v40 = vadd.f32 %v221_v35, %v220_v37  ;;  %v257_v37 = vsel %vm203_vm0, %v706_v29, 0.0 }
  0x22   : > { %v224_v43 = vadd.f32 %v223_v38, %v222_v40  ;;  %v716_v38 = vld [vmem:[%s561_s27 + $0xe8] sm:$0xff] }
  0x24   : > { %v226_v46 = vadd.f32 %v225_v41, %v224_v43  ;;  %v259_v41 = vsel %vm203_vm0, %v711_v34, 0.0  ;;  %v721_v43 = vld [vmem:[%s561_s27 + $0xf0] sm:$0xff] }
  0x26   : > { %v228_v49 = vadd.f32 %v227_v44, %v226_v46  ;;  %v261_v46 = vsel %vm203_vm0, %v716_v38, 0.0 }
  0x28   : > { %v230_v52 = vadd.f32 %v229_v47, %v228_v49  ;;  %v726_v47 = vld [vmem:[%s561_s27 + $0xf8] sm:$0xff] }
  0x2a   : > { %v232_v55 = vadd.f32 %v231_v50, %v230_v52  ;;  %v263_v50 = vsel %vm203_vm0, %v721_v43, 0.0 }
  0x2c   : > { %v234_v58 = vadd.f32 %v233_v53, %v232_v55  ;;  %v265_v53 = vsel %vm203_vm0, %v726_v47, 0.0 }
  0x2e   : > { %v236_v61 = vadd.f32 %v235_v56, %v234_v58 }
  0x30   : > { %v238_v0 = vadd.f32 %v237_v59, %v236_v61 }
  0x32   : > { %v240_v3 = vadd.f32 %v239_v62, %v238_v0 }
  0x34   : > { %v242_v10 = vadd.f32 %v241_v1, %v240_v3  ;;  %v305_v3 = vld [vmem:[%s844_s2] sm:$0xf] }
  0x35   : > { %483 = vmatpush.msk.msra.mxu1 %vm310_vm1, %v305_v3 }
  0x36   : > { %v244_v14 = vadd.f32 %v243_v4, %v242_v10 }
  0x38   : > { %v246_v18 = vadd.f32 %v245_v11, %v244_v14 }
  0x3a   : > { %v248_v22 = vadd.f32 %v247_v15, %v246_v18 }
  0x3c   : > { %v250_v26 = vadd.f32 %v249_v19, %v248_v22 }
  0x3e   : > { %v252_v31 = vadd.f32 %v251_v23, %v250_v26 }
  0x40   : > { %v254_v35 = vadd.f32 %v253_v28, %v252_v31 }
  0x42   : > { %v256_v40 = vadd.f32 %v255_v32, %v254_v35 }
  0x44   : > { %v258_v44 = vadd.f32 %v257_v37, %v256_v40 }
  0x46   : > { %v260_v49 = vadd.f32 %v259_v41, %v258_v44 }
  0x48   : > { %v262_v52 = vadd.f32 %v261_v46, %v260_v49 }
  0x4a   : > { %v264_v55 = vadd.f32 %v263_v50, %v262_v52 }
  0x4c   : > { %v266_v56 = vadd.f32 %v265_v53, %v264_v55 }
  0x4e   : > { %v267_v58 = vrot.slane %v266_v56, 4 }
  0x50   : > { %v268_v59 = vadd.f32 %v267_v58, %v266_v56 }
  0x52   : > { %v269_v61 = vrot.slane %v268_v59, 2 }
  0x54   : > { %v270_v62 = vadd.f32 %v269_v61, %v268_v59 }
  0x56   : > { %v271_v0 = vrot.slane %v270_v62, 1 }
  0x58   : > { %v272_v1 = vadd.f32 %v271_v0, %v270_v62 }
  0x5a   : > { %482 = vmatmul.msk.f32.vlgmr.msra.gmra.mxu0 %vm203_vm0, %v272_v1 }
  0xd7   : > { %v301_v4 = vpop.f32.mrf.mxu0 }
  0xd8   : > { %v304_v10 = vmax.f32 %v301_v4, 0.0 }
  0xda   : > { %484 = vmatmul.msk.f32.vlgmr.msra.gmra.mxu1 %vm306_vm2, %v304_v10 }
 0x157   : > { %v331_v11 = vpop.f32.mrf.mxu1 }
 0x158   : > { %v485_v14 = vmul.f32 -1.442695, %v331_v11 }
 0x15a   : > { %498 = vpow2.f32 %v485_v14 }
 0x160   : > { %v499_v15 = vpop.eup %498 }
 0x161   : > { %v337_v18 = vadd.f32 1.0, %v499_v15 }
 0x163   : > { %500 = vrcp.f32 %v337_v18  ;;  %v349_v26 = vand.u32 2147483648, %v337_v18  ;;  %v347_v31 = vand.u32 2147483647, %v337_v18  ;;  %vm343_vm4 = vweird.f32 %v337_v18 }
 0x165   : > { %v350_v35 = vor.u32 1.1754944e-38, %v349_v26  ;;  %vm348_vm6 = vcmp.eq.f32.partialorder %v347_v31, 8.507059e+37 }
 0x169   : > { %v501_v19 = vpop.eup %500 }
 0x16a   : > { %v339_v22 = vmul.f32 %v501_v19, %v337_v18  ;;  %vm344_vm3 = vweird.f32 %v501_v19 }
 0x16b   : > { %vm345_vm5 = vmor %vm343_vm4, %vm344_vm3 }
 0x16c   : > { %v340_v23 = vsub.f32 1.0, %v339_v22 }
 0x16e   : > { %v341_v28 = vmul.f32 %v501_v19, %v340_v23 }
 0x170   : > { %v342_v32 = vadd.f32 %v501_v19, %v341_v28 }
 0x172   : > { %v346_v37 = vsel %vm345_vm5, %v501_v19, %v342_v32 }
 0x173   : > { %v351_v40 = vsel %vm348_vm6, %v350_v35, %v346_v37 }
 0x174   : > { %v353_v41 = vperm.slane %v351_v40, 0 }
 0x176   : > { %v354_v44 = vmul.f32 %v353_v41, %v564_v5  ;;  %v355_v46 = vmul.f32 %v353_v41, %v567_v6  ;;  %v356_v49 = vmul.f32 %v353_v41, %v570_v7  ;;  %v357_v50 = vmul.f32 %v353_v41, %v573_v8 }
 0x177   : > { %v358_v52 = vmul.f32 %v353_v41, %v585_v13  ;;  %v359_v53 = vmul.f32 %v353_v41, %v593_v17  ;;  %v360_v5 = vmul.f32 %v353_v41, %v601_v21  ;;  %v361_v6 = vmul.f32 %v353_v41, %v606_v24 }
 0x178   : > { %386 = vst.msk [vmem:[%s741_s11] sm:$0xff] %vm203_vm0, %v354_v44  ;;  %v362_v7 = vmul.f32 %v353_v41, %v611_v27  ;;  %v363_v8 = vmul.f32 %v353_v41, %v616_v30  ;;  %v364_v13 = vmul.f32 %v353_v41, %v621_v33  ;;  %v365_v17 = vmul.f32 %v353_v41, %v626_v36 }
 0x179   : > { %387 = vst.msk [vmem:[%s741_s11 + $0x8] sm:$0xff] %vm203_vm0, %v355_v46  ;;  %v366_v21 = vmul.f32 %v353_v41, %v631_v39  ;;  %v367_v24 = vmul.f32 %v353_v41, %v636_v42  ;;  %v368_v27 = vmul.f32 %v353_v41, %v641_v45  ;;  %v369_v30 = vmul.f32 %v353_v41, %v646_v48 }
 0x17a   : > { %388 = vst.msk [vmem:[%s741_s11 + $0x10] sm:$0xff] %vm203_vm0, %v356_v49  ;;  %v370_v33 = vmul.f32 %v353_v41, %v651_v51  ;;  %v371_v36 = vmul.f32 %v353_v41, %v656_v54  ;;  %v372_v39 = vmul.f32 %v353_v41, %v661_v57  ;;  %v373_v42 = vmul.f32 %v353_v41, %v666_v60 }
 0x17b   : > { %389 = vst.msk [vmem:[%s741_s11 + $0x18] sm:$0xff] %vm203_vm0, %v357_v50  ;;  %v374_v45 = vmul.f32 %v353_v41, %v671_v63  ;;  %v375_v48 = vmul.f32 %v353_v41, %v676_v2  ;;  %v376_v51 = vmul.f32 %v353_v41, %v681_v9  ;;  %v377_v54 = vmul.f32 %v353_v41, %v686_v12 }
 0x17c   : > { %390 = vst.msk [vmem:[%s741_s11 + $0x20] sm:$0xff] %vm203_vm0, %v358_v52  ;;  %v378_v57 = vmul.f32 %v353_v41, %v691_v16  ;;  %v379_v60 = vmul.f32 %v353_v41, %v696_v20  ;;  %v380_v63 = vmul.f32 %v353_v41, %v701_v25  ;;  %v381_v2 = vmul.f32 %v353_v41, %v706_v29 }
 0x17d   : > { %391 = vst.msk [vmem:[%s741_s11 + $0x28] sm:$0xff] %vm203_vm0, %v359_v53  ;;  %v382_v9 = vmul.f32 %v353_v41, %v711_v34  ;;  %v383_v12 = vmul.f32 %v353_v41, %v716_v38  ;;  %v384_v16 = vmul.f32 %v353_v41, %v721_v43  ;;  %v385_v20 = vmul.f32 %v353_v41, %v726_v47 }
 0x17e   : > { %392 = vst.msk [vmem:[%s741_s11 + $0x30] sm:$0xff] %vm203_vm0, %v360_v5 }
 0x17f   : > { %393 = vst.msk [vmem:[%s741_s11 + $0x38] sm:$0xff] %vm203_vm0, %v361_v6 }
 0x180   : > { %394 = vst.msk [vmem:[%s741_s11 + $0x40] sm:$0xff] %vm203_vm0, %v362_v7 }
 0x181   : > { %395 = vst.msk [vmem:[%s741_s11 + $0x48] sm:$0xff] %vm203_vm0, %v363_v8 }
 0x182   : > { %396 = vst.msk [vmem:[%s741_s11 + $0x50] sm:$0xff] %vm203_vm0, %v364_v13 }
 0x183   : > { %397 = vst.msk [vmem:[%s741_s11 + $0x58] sm:$0xff] %vm203_vm0, %v365_v17 }
 0x184   : > { %398 = vst.msk [vmem:[%s741_s11 + $0x60] sm:$0xff] %vm203_vm0, %v366_v21 }
 0x185   : > { %399 = vst.msk [vmem:[%s741_s11 + $0x68] sm:$0xff] %vm203_vm0, %v367_v24 }
 0x186   : > { %400 = vst.msk [vmem:[%s741_s11 + $0x70] sm:$0xff] %vm203_vm0, %v368_v27 }
 0x187   : > { %401 = vst.msk [vmem:[%s741_s11 + $0x78] sm:$0xff] %vm203_vm0, %v369_v30 }
 0x188   : > { %402 = vst.msk [vmem:[%s741_s11 + $0x80] sm:$0xff] %vm203_vm0, %v370_v33 }
 0x189   : > { %403 = vst.msk [vmem:[%s741_s11 + $0x88] sm:$0xff] %vm203_vm0, %v371_v36 }
 0x18a   : > { %404 = vst.msk [vmem:[%s741_s11 + $0x90] sm:$0xff] %vm203_vm0, %v372_v39 }
 0x18b   : > { %405 = vst.msk [vmem:[%s741_s11 + $0x98] sm:$0xff] %vm203_vm0, %v373_v42 }
 0x18c   : > { %406 = vst.msk [vmem:[%s741_s11 + $0xa0] sm:$0xff] %vm203_vm0, %v374_v45 }
 0x18d   : > { %407 = vst.msk [vmem:[%s741_s11 + $0xa8] sm:$0xff] %vm203_vm0, %v375_v48 }
 0x18e   : > { %408 = vst.msk [vmem:[%s741_s11 + $0xb0] sm:$0xff] %vm203_vm0, %v376_v51 }
 0x18f   : > { %409 = vst.msk [vmem:[%s741_s11 + $0xb8] sm:$0xff] %vm203_vm0, %v377_v54 }
 0x190   : > { %410 = vst.msk [vmem:[%s741_s11 + $0xc0] sm:$0xff] %vm203_vm0, %v378_v57 }
 0x191   : > { %411 = vst.msk [vmem:[%s741_s11 + $0xc8] sm:$0xff] %vm203_vm0, %v379_v60 }
 0x192   : > { %412 = vst.msk [vmem:[%s741_s11 + $0xd0] sm:$0xff] %vm203_vm0, %v380_v63 }
 0x193   : > { %413 = vst.msk [vmem:[%s741_s11 + $0xd8] sm:$0xff] %vm203_vm0, %v381_v2 }
 0x194   : > { %414 = vst.msk [vmem:[%s741_s11 + $0xe0] sm:$0xff] %vm203_vm0, %v382_v9 }
 0x195   : > { %415 = vst.msk [vmem:[%s741_s11 + $0xe8] sm:$0xff] %vm203_vm0, %v383_v12 }
 0x196   : > { %416 = vst.msk [vmem:[%s741_s11 + $0xf0] sm:$0xff] %vm203_vm0, %v384_v16 }
 0x197   : > { %417 = vst.msk [vmem:[%s741_s11 + $0xf8] sm:$0xff] %vm203_vm0, %v385_v20 }
 0x198 PF: > { %s13_s12 = sadd.s32 1, %s508_s12  }
 0x199   : > { %p10_p4 = scmp.ge.s32.totalorder %s13_s12, 4  }
 0x19b   :  { %12 = sbr.rel (!%p10_p4) target bundleno = 1 (0x1), region = 62 }

</bundles_post_ra>
